<compile_context>
chip_gen: v6e
topology: v6e:2x2x1
jax: 0.10.0
libtpu: 0.0.40
codegen_flags: <defaults>
</compile_context>

<pallas_src>
import functools
import math

import jax
import jax.numpy as jnp
from jax.experimental import pallas as pl
from jax.experimental.pallas import tpu as pltpu


def _round_up(x, m):
    return ((x + m - 1) // m) * m


# ----------------------------------------------------------------------------
# Fused kernel: one (TM, d_model) row tile per grid step.
# ----------------------------------------------------------------------------
def poswise_ffn_kernel(x_ref, w1_ref, w2_ref, vec_ref, o_ref, *,
                       d_model, d_ff, eps):
    """x_ref:  (TM, d_model) f32 rows = batch*seq tile; features on lanes.
       w1_ref: (d_model, d_ff)  bf16 -- conv1 weight, pre-transposed (in, out)
       w2_ref: (d_ff, d_model)  bf16 -- conv2 weight, pre-transposed (in, out)
       vec_ref:(4, Vmax) f32 packed rows = [b1 | b2 | ln_gamma | ln_beta]
       o_ref:  (TM, d_model) f32
    """
    x = x_ref[...]                                              # (TM, D) f32

    b1 = vec_ref[0:1, 0:d_ff]                                   # (1, d_ff)
    b2 = vec_ref[1:2, 0:d_model]                                # (1, D)
    ln_g = vec_ref[2:3, 0:d_model]                              # (1, D)
    ln_b = vec_ref[3:4, 0:d_model]                              # (1, D)

    # conv1 (k=1) + ReLU  -- bf16 MXU operands, f32 accumulate
    h = jnp.dot(x.astype(jnp.bfloat16), w1_ref[...],
                preferred_element_type=jnp.float32) + b1        # (TM, d_ff)
    h = jnp.maximum(h, 0.0)

    # conv2 (k=1)
    y = jnp.dot(h.astype(jnp.bfloat16), w2_ref[...],
                preferred_element_type=jnp.float32) + b2        # (TM, D)

    # residual + LayerNorm over the feature dim (f32 epilogue, CSE'd)
    z = y + x
    mean = jnp.mean(z, axis=-1, keepdims=True)
    zc = z - mean
    var = jnp.mean(zc * zc, axis=-1, keepdims=True)
    scale = jax.lax.rsqrt(var + eps) * ln_g
    o_ref[...] = zc * scale + ln_b


# ----------------------------------------------------------------------------
# Wrapper
# ----------------------------------------------------------------------------
def poswise_ffn(x, params, *, eps=1e-5, tm=512):
    """x: (B, S, d_model) float32. Returns (B, S, d_model) float32."""
    b, s, d_model = x.shape
    d_ff = params["w1"].shape[1]
    m = b * s

    # Row tile: multiple of 8 sublanes, capped at `tm`; pad M to a multiple.
    tile = min(tm, _round_up(m, 8))
    m_pad = _round_up(m, tile)
    x2 = x.reshape(m, d_model)
    if m_pad != m:
        x2 = jnp.pad(x2, ((0, m_pad - m), (0, 0)))
    grid = (m_pad // tile,)

    # bf16 weights (halves weight DMA, native MXU path on all generations).
    w1 = params["w1"].astype(jnp.bfloat16)                      # (D, d_ff)
    w2 = params["w2"].astype(jnp.bfloat16)                      # (d_ff, D)

    # Pack all small f32 vectors into one lane-aligned slab (4, Vmax).
    vmax = max(d_model, d_ff)
    vec = jnp.zeros((4, vmax), jnp.float32)
    vec = vec.at[0, :d_ff].set(params["b1"])
    vec = vec.at[1, :d_model].set(params["b2"])
    vec = vec.at[2, :d_model].set(params["ln_g"])
    vec = vec.at[3, :d_model].set(params["ln_b"])

    flops = 2 * m_pad * d_model * d_ff * 2 + 10 * m_pad * d_model
    bytes_accessed = (4 * x2.size + 2 * (w1.size + w2.size)
                      + 4 * vec.size + 4 * m_pad * d_model)

    out = pl.pallas_call(
        functools.partial(poswise_ffn_kernel,
                          d_model=d_model, d_ff=d_ff, eps=eps),
        out_shape=jax.ShapeDtypeStruct((m_pad, d_model), jnp.float32),
        grid_spec=pltpu.PrefetchScalarGridSpec(
            num_scalar_prefetch=0,
            grid=grid,
            in_specs=[
                # Activation stream: one row tile per grid step.
                pl.BlockSpec((tile, d_model), lambda i: (i, 0)),
                # Weights + vec slab: constant block index -> fetched once,
                # VMEM-resident across all grid steps.
                pl.BlockSpec((d_model, d_ff), lambda i: (0, 0)),
                pl.BlockSpec((d_ff, d_model), lambda i: (0, 0)),
                pl.BlockSpec((4, vmax), lambda i: (0, 0)),
            ],
            out_specs=pl.BlockSpec((tile, d_model), lambda i: (i, 0)),
        ),
        compiler_params=pltpu.CompilerParams(
            dimension_semantics=("parallel",),      # shard rows across TCs (v7x)
            vmem_limit_bytes=32 * 1024 * 1024,      # safe on v5e/v6e/v7x
        ),
        cost_estimate=pl.CostEstimate(flops=flops,
                                      transcendentals=m_pad,
                                      bytes_accessed=bytes_accessed),
    )(x2, w1, w2, vec)
    return out[:m].reshape(b, s, d_model)


# ----------------------------------------------------------------------------
# Pure-JAX f32 reference (same math, for a correctness check)
# ----------------------------------------------------------------------------
def poswise_ffn_reference(x, params, eps=1e-5):
    h = jnp.maximum(jnp.einsum("bsd,df->bsf", x, params["w1"]) + params["b1"], 0.0)
    y = jnp.einsum("bsf,fd->bsd", h, params["w2"]) + params["b2"]
    z = y + x
    mean = jnp.mean(z, axis=-1, keepdims=True)
    var = jnp.mean((z - mean) ** 2, axis=-1, keepdims=True)
    return (z - mean) * jax.lax.rsqrt(var + eps) * params["ln_g"] + params["ln_b"]


# ----------------------------------------------------------------------------
# Deterministic PyTorch-style init (uniform with bound 1/sqrt(fan_in))
# ----------------------------------------------------------------------------
def init_params(key, d_model, d_ff):
    k1, k2, k3, k4 = jax.random.split(key, 4)
    b1 = 1.0 / math.sqrt(d_model)     # conv1 fan_in = d_model * kernel(1)
    b2 = 1.0 / math.sqrt(d_ff)        # conv2 fan_in = d_ff * kernel(1)
    return dict(
        w1=jax.random.uniform(k1, (d_model, d_ff), jnp.float32, -b1, b1),
        b1=jax.random.uniform(k2, (d_ff,), jnp.float32, -b1, b1),
        w2=jax.random.uniform(k3, (d_ff, d_model), jnp.float32, -b2, b2),
        b2=jax.random.uniform(k4, (d_model,), jnp.float32, -b2, b2),
        ln_g=jnp.ones((d_model,), jnp.float32),
        ln_b=jnp.zeros((d_model,), jnp.float32),
    )


# ----------------------------------------------------------------------------
if __name__ == "__main__":
    B, S = 2, 8
    D_MODEL = 128     # lane-aligned feature dim (lane-dense loads/stores)
    D_FF = 256

    key = jax.random.PRNGKey(0)
    kx, kp = jax.random.split(key)
    x = jax.random.normal(kx, (B, S, D_MODEL), jnp.float32)
    params = init_params(kp, D_MODEL, D_FF)

    out = poswise_ffn(x, params)
    out = jax.block_until_ready(out)

    ref = jax.block_until_ready(poswise_ffn_reference(x, params))
    assert out.shape == (B, S, D_MODEL)
    # bf16 MXU operands (f32 accumulate) -> loosened tolerance vs f32 reference.
    assert jnp.allclose(out, ref, atol=3e-2, rtol=3e-2), \
        float(jnp.max(jnp.abs(out - ref)))

    print("KERNEL_OK")
</pallas_src>

<mosaic_0001>
module attributes {stable_mosaic.version = 11 : i64} {
  func.func @poswise_ffn_kernel(%arg0: i32, %arg1: memref<16x128xf32, #tpu.memory_space<vmem>>, %arg2: memref<128x256xbf16, #tpu.memory_space<vmem>>, %arg3: memref<256x128xbf16, #tpu.memory_space<vmem>>, %arg4: memref<4x256xf32, #tpu.memory_space<vmem>>, %arg5: memref<16x128xf32, #tpu.memory_space<vmem>>) attributes {dimension_semantics = [#tpu.dimension_semantics<parallel>], iteration_bounds = array<i64: 1>, scalar_prefetch = 0 : i64, scratch_operands = 0 : i64, tpu.core_type = #tpu.core_type<tc>, window_params = [{transform_indices = @transform_0, window_bounds = array<i64: 16, 128>}, {pipeline_mode = #tpu.pipeline_mode<synchronous>, transform_indices = @transform_1, window_bounds = array<i64: 128, 256>}, {pipeline_mode = #tpu.pipeline_mode<synchronous>, transform_indices = @transform_2, window_bounds = array<i64: 256, 128>}, {pipeline_mode = #tpu.pipeline_mode<synchronous>, transform_indices = @transform_3, window_bounds = array<i64: 4, 256>}, {transform_indices = @transform_4, window_bounds = array<i64: 16, 128>}]} {
    %c0 = arith.constant 0 : index
    %c0_0 = arith.constant 0 : index
    %0 = vector.load %arg1[%c0, %c0_0] : memref<16x128xf32, #tpu.memory_space<vmem>>, vector<16x128xf32>
    %c0_1 = arith.constant 0 : index
    %c0_2 = arith.constant 0 : index
    %1 = vector.load %arg4[%c0_1, %c0_2] : memref<4x256xf32, #tpu.memory_space<vmem>>, vector<1x256xf32>
    %c1 = arith.constant 1 : index
    %c0_3 = arith.constant 0 : index
    %2 = vector.load %arg4[%c1, %c0_3] : memref<4x256xf32, #tpu.memory_space<vmem>>, vector<1x128xf32>
    %c2 = arith.constant 2 : index
    %c0_4 = arith.constant 0 : index
    %3 = vector.load %arg4[%c2, %c0_4] : memref<4x256xf32, #tpu.memory_space<vmem>>, vector<1x128xf32>
    %c3 = arith.constant 3 : index
    %c0_5 = arith.constant 0 : index
    %4 = vector.load %arg4[%c3, %c0_5] : memref<4x256xf32, #tpu.memory_space<vmem>>, vector<1x128xf32>
    %5 = arith.truncf %0 : vector<16x128xf32> to vector<16x128xbf16>
    %c0_6 = arith.constant 0 : index
    %c0_7 = arith.constant 0 : index
    %6 = vector.load %arg2[%c0_6, %c0_7] : memref<128x256xbf16, #tpu.memory_space<vmem>>, vector<128x256xbf16>
    %cst = arith.constant dense<0.000000e+00> : vector<16x256xf32>
    %7 = tpu.matmul %5, %6, %cst {dimension_numbers = #tpu.dot_dimension_numbers<[1], [0], [0], [1], [0, 0, 1, 1], [], []>} : vector<16x128xbf16>, vector<128x256xbf16>, vector<16x256xf32> -> vector<16x256xf32>
    %8 = vector.broadcast %1 : vector<1x256xf32> to vector<16x256xf32>
    %9 = arith.addf %7, %8 : vector<16x256xf32>
    %cst_8 = arith.constant 0.000000e+00 : f32
    %10 = vector.broadcast %cst_8 : f32 to vector<16x256xf32>
    %11 = arith.maximumf %9, %10 : vector<16x256xf32>
    %12 = arith.truncf %11 : vector<16x256xf32> to vector<16x256xbf16>
    %c0_9 = arith.constant 0 : index
    %c0_10 = arith.constant 0 : index
    %13 = vector.load %arg3[%c0_9, %c0_10] : memref<256x128xbf16, #tpu.memory_space<vmem>>, vector<256x128xbf16>
    %cst_11 = arith.constant dense<0.000000e+00> : vector<16x128xf32>
    %14 = tpu.matmul %12, %13, %cst_11 {dimension_numbers = #tpu.dot_dimension_numbers<[1], [0], [0], [1], [0, 0, 1, 1], [], []>} : vector<16x256xbf16>, vector<256x128xbf16>, vector<16x128xf32> -> vector<16x128xf32>
    %15 = vector.broadcast %2 : vector<1x128xf32> to vector<16x128xf32>
    %16 = arith.addf %14, %15 : vector<16x128xf32>
    %17 = arith.addf %16, %0 : vector<16x128xf32>
    %cst_12 = arith.constant dense<0.000000e+00> : vector<16xf32>
    %18 = vector.multi_reduction <add>, %17, %cst_12 [1] : vector<16x128xf32> to vector<16xf32>
    %19 = vector.shape_cast %18 : vector<16xf32> to vector<16x1xf32>
    %cst_13 = arith.constant 1.280000e+02 : f32
    %20 = vector.broadcast %cst_13 : f32 to vector<16x1xf32>
    %21 = arith.divf %19, %20 : vector<16x1xf32>
    %22 = vector.broadcast %21 : vector<16x1xf32> to vector<16x128xf32>
    %23 = arith.subf %17, %22 : vector<16x128xf32>
    %24 = arith.mulf %23, %23 : vector<16x128xf32>
    %cst_14 = arith.constant dense<0.000000e+00> : vector<16xf32>
    %25 = vector.multi_reduction <add>, %24, %cst_14 [1] : vector<16x128xf32> to vector<16xf32>
    %26 = vector.shape_cast %25 : vector<16xf32> to vector<16x1xf32>
    %cst_15 = arith.constant 1.280000e+02 : f32
    %27 = vector.broadcast %cst_15 : f32 to vector<16x1xf32>
    %28 = arith.divf %26, %27 : vector<16x1xf32>
    %cst_16 = arith.constant 9.99999974E-6 : f32
    %29 = vector.broadcast %cst_16 : f32 to vector<16x1xf32>
    %30 = arith.addf %28, %29 : vector<16x1xf32>
    %31 = math.rsqrt %30 : vector<16x1xf32>
    %32 = vector.broadcast %31 : vector<16x1xf32> to vector<16x128xf32>
    %33 = vector.broadcast %3 : vector<1x128xf32> to vector<16x128xf32>
    %34 = arith.mulf %32, %33 : vector<16x128xf32>
    %35 = arith.mulf %23, %34 : vector<16x128xf32>
    %36 = vector.broadcast %4 : vector<1x128xf32> to vector<16x128xf32>
    %37 = arith.addf %35, %36 : vector<16x128xf32>
    %c0_17 = arith.constant 0 : index
    %c0_18 = arith.constant 0 : index
    %38 = vector.load %arg5[%c0_17, %c0_18] : memref<16x128xf32, #tpu.memory_space<vmem>>, vector<16x128xf32>
    tpu.vector_store %arg5[%c0_17, %c0_18], %37 {strides = array<i32>} : memref<16x128xf32, #tpu.memory_space<vmem>>, vector<16x128xf32>,
    return
  }
  func.func @transform_0(%arg0: i32) -> (i32, i32) {
    %c0_i32 = arith.constant 0 : i32
    %c0_i32_0 = arith.constant 0 : i32
    return %arg0, %c0_i32 : i32, i32
  }
  func.func @transform_1(%arg0: i32) -> (i32, i32) {
    %c0_i32 = arith.constant 0 : i32
    %c0_i32_0 = arith.constant 0 : i32
    %c0_i32_1 = arith.constant 0 : i32
    return %c0_i32, %c0_i32_0 : i32, i32
  }
  func.func @transform_2(%arg0: i32) -> (i32, i32) {
    %c0_i32 = arith.constant 0 : i32
    %c0_i32_0 = arith.constant 0 : i32
    %c0_i32_1 = arith.constant 0 : i32
    return %c0_i32, %c0_i32_0 : i32, i32
  }
  func.func @transform_3(%arg0: i32) -> (i32, i32) {
    %c0_i32 = arith.constant 0 : i32
    %c0_i32_0 = arith.constant 0 : i32
    %c0_i32_1 = arith.constant 0 : i32
    return %c0_i32, %c0_i32_0 : i32, i32
  }
  func.func @transform_4(%arg0: i32) -> (i32, i32) {
    %c0_i32 = arith.constant 0 : i32
    %c0_i32_0 = arith.constant 0 : i32
    return %arg0, %c0_i32 : i32, i32
  }
}

</mosaic_0001>

<bundles_post_ra>
// kernel: tpu_custom_call.1
= control target key start
LH: loop header
LB: loop body
LE: loop exit
PB: predicated region body
PF: predicated region fallthrough
CT: control target
= control target key end

     0   :  { %9 = vsyncpa [#allocation3], 0  ;;  %s744_s0 = inlined_call_operand.hbm [shape: f32[16,128], index: 0, kind: input, shape index: {}]   ;;  %s745_s1 = inlined_call_operand.hbm [shape: bf16[128,256], index: 1, kind: input, shape index: {}]   ;;  %s746_s2 = inlined_call_operand.hbm [shape: bf16[256,128], index: 2, kind: input, shape index: {}]   ;;  %s747_s3 = inlined_call_operand.hbm [shape: f32[4,256], index: 3, kind: input, shape index: {}]   ;;  %s748_s4 = inlined_call_operand.hbm [shape: f32[16,128], index: 4, kind: output, shape index: {}]  }
   0x1   :  { %10 = vsyncpa [#allocation6], 0 }
   0x2   :  { %11 = vsyncpa [#allocation9], 0 }
   0x3   :  { %12 = vsyncpa [#allocation4], 0  ;;  %s685_s15 = smov [#allocation5]   ;;  %s686_s17 = smov [#allocation2]  }
   0x4   :  { %s30_s16 = sshll.u32 %s685_s15, 4  ;;  %s18_s18 = sshll.u32 %s686_s17, 4  ;;  %s31_s16 = int_to_ptr.vmem [resolvable:$true] %s30_s16  ;;  %s19_s18 = int_to_ptr.vmem [resolvable:$true] %s18_s18 }
   0x5   :  { %s585_s19 = scalar_lea.vmem %s31_s16, 2048  ;;  %p590_p1 = scmp.lt.s32.totalorder %s31_s16, %s31_s16 }
   0x6   :  { %p586_p0 = scmp.ne.s32.totalorder %s31_s16, %s585_s19  ;;  %p591_p2 = scmp.lt.s32.totalorder %s585_s19, %s585_s19 }
   0x8   :  { %p592_p3 = por %p591_p2, %p590_p1 }
   0xa   :  { %p593_p4 = pnand %p592_p3, %p586_p0 }
   0xc   :  { %596 = shalt.err (!%p593_p4)
}
   0xd   :  { %s687_s20 = smov 128   ;;  %s688_s21 = smov 8  }
   0xe   :  { %36 = dma.hbm_to_vmem [thread:$0]  %s745_s1, 2048, %s31_s16, [#allocation6], %s687_s20, %s687_s20, %s688_s21  }
   0xf   :  { %s605_s24 = scalar_lea.vmem %s19_s18, 256  ;;  %p610_p6 = scmp.lt.s32.totalorder %s19_s18, %s19_s18 }
  0x10   :  { %p606_p5 = scmp.ne.s32.totalorder %s19_s18, %s605_s24  ;;  %p611_p7 = scmp.lt.s32.totalorder %s605_s24, %s605_s24 }
  0x12   :  { %p612_p8 = por %p611_p7, %p610_p6 }
  0x14   :  { %p613_p9 = pnand %p612_p8, %p606_p5 }
  0x16   :  { %616 = shalt.err (!%p613_p9)
}
  0x17   :  { %24 = dma.hbm_to_vmem [thread:$0]  %s744_s0, 256, %s19_s18, [#allocation3], %s687_s20, %s687_s20, %s688_s21  }
  0x18   :  { %s689_s27 = smov [#allocation7]  }
  0x19   :  { %s42_s28 = sshll.u32 %s689_s27, 4  ;;  %s43_s28 = int_to_ptr.vmem [resolvable:$true] %s42_s28 }
  0x1a   :  { %s625_s29 = scalar_lea.vmem %s43_s28, 2048  ;;  %p630_p11 = scmp.lt.s32.totalorder %s43_s28, %s43_s28 }
  0x1b   :  { %p626_p10 = scmp.ne.s32.totalorder %s43_s28, %s625_s29  ;;  %p631_p12 = scmp.lt.s32.totalorder %s625_s29, %s625_s29 }
  0x1d   :  { %p632_p13 = por %p631_p12, %p630_p11 }
  0x1f   :  { %p633_p0 = pnand %p632_p13, %p626_p10 }
  0x21   :  { %636 = shalt.err (!%p633_p0)
}
  0x22   :  { %s690_s1 = smov 64   ;;  %s691_s30 = smov 4  }
  0x23   :  { %48 = dma.hbm_to_vmem [thread:$0]  %s746_s2, 2048, %s43_s28, [#allocation6], %s690_s1, %s690_s1, %s691_s30  }
  0x24   :  { %s692_s7 = smov [#allocation8]  }
  0x25   :  { %s55_s8 = sshll.u32 %s692_s7, 4  ;;  %s56_s8 = int_to_ptr.vmem [resolvable:$true] %s55_s8 }
  0x26   :  { %s645_s0 = scalar_lea.vmem %s56_s8, 128  ;;  %p650_p2 = scmp.lt.s32.totalorder %s56_s8, %s56_s8 }
  0x27   :  { %p646_p1 = scmp.ne.s32.totalorder %s56_s8, %s645_s0  ;;  %p651_p3 = scmp.lt.s32.totalorder %s645_s0, %s645_s0 }
  0x29   :  { %p652_p4 = por %p651_p3, %p650_p2 }
  0x2b   :  { %p653_p5 = pnand %p652_p4, %p646_p1 }
  0x2d   :  { %656 = shalt.err (!%p653_p5)
}
  0x2e   :  { %58 = dma.hbm_to_vmem [thread:$0]  %s747_s3, 128, %s56_s8, [#allocation9]  }
  0x2f   :  { %677 = dma.done.wait [#allocation3], 256  }
  0x30   :  { %678 = vsyncadd [#allocation3], 4294967040 }
  0x31   :  { %679 = dma.done.wait [#allocation6], 4096  }
  0x32   :  { %680 = vsyncadd [#allocation6], 4294963200 }
  0x33   :  { %681 = dma.done.wait [#allocation9], 128  }
  0x34   :  { %682 = vsyncadd [#allocation9], 4294967168  ;;  %v693_v0 = vmov 0   ;;  %v533_v1 = vld [vmem:[#allocation5 + $0x74] ss:$8 sps:$4 sm:$0xff]   ;;  %v561_v16 = vld [vmem:[#allocation7 + $0x68] sm:$0xff]   ;;  %v96_v36 = vlaneseq }
  0x35   :  { %218 = vmatprep.mubr.bf16.mxu0 %v693_v0  ;;  %v535_v2 = vld [vmem:[#allocation5 + $0x70] ss:$8 sps:$4 sm:$0xff]   ;;  %186 = vmatprep.subr.bf16.mxu0 %v533_v1  ;;  %v536_v3 = vld [vmem:[#allocation5 + $0x64] ss:$8 sps:$4 sm:$0xff]   ;;  %v538_v4 = vld [vmem:[#allocation5 + $0x60] ss:$8 sps:$4 sm:$0xff]  }
  0x36   :  { %187 = vmatpush1.bf16.msra.mxu0 %v535_v2  ;;  %v539_v5 = vld [vmem:[#allocation5 + $0x54] ss:$8 sps:$4 sm:$0xff]   ;;  %v541_v6 = vld [vmem:[#allocation5 + $0x50] ss:$8 sps:$4 sm:$0xff]   ;;  %v542_v7 = vld [vmem:[#allocation5 + $0x44] ss:$8 sps:$4 sm:$0xff]  }
  0x37   :  { %188 = vmatprep.subr.bf16.mxu0 %v536_v3  ;;  %v544_v8 = vld [vmem:[#allocation5 + $0x40] ss:$8 sps:$4 sm:$0xff]   ;;  %v545_v9 = vld [vmem:[#allocation5 + $0x34] ss:$8 sps:$4 sm:$0xff]   ;;  %v547_v11 = vld [vmem:[#allocation5 + $0x30] ss:$8 sps:$4 sm:$0xff]  }
  0x38   :  { %v557_v10 = vld [vmem:[#allocation7 + $0x78] sm:$0xff]   ;;  %v548_v13 = vld [vmem:[#allocation5 + $0x24] ss:$8 sps:$4 sm:$0xff]   ;;  %v559_v14 = vld [vmem:[#allocation7 + $0x70] sm:$0xff]   ;;  %v97_v37 = vshrl.u32 %v96_v36, 7  ;;  %s694_s2 = smov [#allocation10]  }
  0x39   :  { %v558_v12 = vld [vmem:[#allocation7 + $0x38] sm:$0xff]   ;;  %501 = vmatprep.subr.bf16.mxu1 %v557_v10  ;;  %v560_v15 = vld [vmem:[#allocation7 + $0x30] sm:$0xff]   ;;  %v550_v17 = vld [vmem:[#allocation5 + $0x20] ss:$8 sps:$4 sm:$0xff]   ;;  %s452_s3 = sshll.u32 %s694_s2, 4  ;;  %s453_s3 = int_to_ptr.vmem [resolvable:$true] %s452_s3 }
  0x3a   :  { %189 = vmatpush1.bf16.msra.mxu0 %v538_v4  ;;  %502 = vmatpush3.bf16.msra.mxu1 %v558_v12  ;;  %v551_v18 = vld [vmem:[#allocation5 + $0x14] ss:$8 sps:$4 sm:$0xff]   ;;  %v562_v19 = vld [vmem:[#allocation7 + $0x28] sm:$0xff]   ;;  %v563_v20 = vld [vmem:[#allocation7 + $0x60] sm:$0xff]   ;;  %v102_v38 = vsub.s32 1, %v97_v37  ;;  %v98_v39 = vsub.s32 0, %v97_v37  ;;  %p662_p7 = scmp.lt.s32.totalorder %s453_s3, %s453_s3 }
  0x3b   :  { %190 = vmatprep.subr.bf16.mxu0 %v539_v5  ;;  %503 = vmatprep.subr.bf16.mxu1 %v559_v14  ;;  %v553_v21 = vld [vmem:[#allocation5 + $0x10] ss:$8 sps:$4 sm:$0xff]   ;;  %v564_v22 = vld [vmem:[#allocation7 + $0x20] sm:$0xff]   ;;  %v569_v32 = vld [vmem:[#allocation7 + $0x48] sm:$0xff]   ;;  %s657_s11 = scalar_lea.vmem %s453_s3, 256 }
  0x3c   :  { %v554_v23 = vld [vmem:[#allocation5 + $0x4] ss:$8 sps:$4 sm:$0xff]   ;;  %v565_v24 = vld [vmem:[#allocation7 + $0x58] sm:$0xff]   ;;  %v556_v25 = vld [vmem:[#allocation5] ss:$8 sps:$4 sm:$0xff]   ;;  %p658_p6 = scmp.ne.s32.totalorder %s453_s3, %s657_s11  ;;  %p663_p8 = scmp.lt.s32.totalorder %s657_s11, %s657_s11 }
  0x3d   :  { %v72_v26 = vld [vmem:[#allocation2] sm:$0xff]  ;;  %v73_v27 = vld [vmem:[#allocation2 + $0x8] sm:$0xff]  ;;  %v570_v33 = vld [vmem:[#allocation7 + $0x8] sm:$0xff]  }
  0x3e   :  { %191 = vmatpush1.bf16.msra.mxu0 %v541_v6  ;;  %504 = vmatpush3.bf16.msra.mxu1 %v560_v15  ;;  %v566_v28 = vld [vmem:[#allocation7 + $0x18] sm:$0xff]   ;;  %v78_v29 = vpack.c.bf16 %v73_v27, %v72_v26  ;;  %v567_v30 = vld [vmem:[#allocation7 + $0x50] sm:$0xff]   ;;  %v571_v34 = vld [vmem:[#allocation7 + $0x40] sm:$0xff]   ;;  %p664_p9 = por %p663_p8, %p662_p7 }
  0x3f   :  { %192 = vmatprep.subr.bf16.mxu0 %v542_v7  ;;  %505 = vmatprep.subr.bf16.mxu1 %v561_v16  ;;  %v568_v31 = vld [vmem:[#allocation7 + $0x10] sm:$0xff]   ;;  %v572_v35 = vld [vmem:[#allocation7] sm:$0xff]  }
  0x40   :  { %v74_v40 = vld [vmem:[#allocation8] ss:$4 sm:$0x3]  ;;  %v482_v58 = vld [vmem:[#allocation8 + $0x1] ss:$0 sm:$0xff]  ;;  %p665_p10 = pnand %p664_p9, %p658_p6 }
  0x41   :  { %v103_v42 = vrot.slane %v74_v40, %v102_v38  ;;  %v99_v43 = vrot.slane %v74_v40, %v98_v39 }
  0x42   :  { %193 = vmatpush1.bf16.msra.mxu0 %v544_v8  ;;  %506 = vmatpush3.bf16.msra.mxu1 %v562_v19 }
  0x43   :  { %194 = vmatprep.subr.bf16.mxu0 %v545_v9  ;;  %507 = vmatprep.subr.bf16.mxu1 %v563_v20 }
  0x46   :  { %195 = vmatpush1.bf16.msra.mxu0 %v547_v11  ;;  %508 = vmatpush3.bf16.msra.mxu1 %v564_v22 }
  0x47   :  { %196 = vmatprep.subr.bf16.mxu0 %v548_v13  ;;  %509 = vmatprep.subr.bf16.mxu1 %v565_v24 }
  0x4a   :  { %197 = vmatpush1.bf16.msra.mxu0 %v550_v17  ;;  %510 = vmatpush3.bf16.msra.mxu1 %v566_v28 }
  0x4b   :  { %198 = vmatprep.subr.bf16.mxu0 %v551_v18  ;;  %511 = vmatprep.subr.bf16.mxu1 %v567_v30  ;;  %v499_v18 = vld [vmem:[#allocation8 + $0x2] ss:$0 sm:$0xff] }
  0x4e   :  { %199 = vmatpush1.bf16.msra.mxu0 %v553_v21  ;;  %512 = vmatpush3.bf16.msra.mxu1 %v568_v31  ;;  %v500_v21 = vld [vmem:[#allocation8 + $0x3] ss:$0 sm:$0xff] }
  0x4f   :  { %200 = vmatprep.subr.bf16.mxu0 %v554_v23  ;;  %513 = vmatprep.subr.bf16.mxu1 %v569_v32 }
  0x52   :  { %201 = vmatpush1.bf16.msra.mxu0 %v556_v25  ;;  %514 = vmatpush3.bf16.msra.mxu1 %v570_v33 }
  0x53   :  { %515 = vmatprep.subr.bf16.mxu1 %v571_v34 }
  0x55   :  { %219 = vmatmul.mubr.bf16.vlgmr.msra.gmra.mxu0 %v78_v29 }
  0x56   :  { %516 = vmatpush3.bf16.msra.mxu1 %v572_v35 }
 0x115   :  { %v220_v41 = vpop.f32.mrf.mxu0 }
 0x116   :  { %v221_v48 = vadd.f32 %v220_v41, %v99_v43 }
 0x117   :  { %v222_v44 = vpop.f32.mrf.mxu0 }
 0x118   :  { %v223_v46 = vadd.f32 %v222_v44, %v103_v42  ;;  %v229_v54 = vmax.f32 %v221_v48, 0.0 }
 0x119   :  { %v224_v45 = vpop.f32.mrf.mxu0 }
 0x11a   :  { %v225_v47 = vadd.f32 %v224_v45, %v99_v43  ;;  %v230_v52 = vmax.f32 %v223_v46, 0.0 }
 0x11b   :  { %v226_v49 = vpop.f32.mrf.mxu0 }
 0x11c   :  { %v227_v50 = vadd.f32 %v226_v49, %v103_v42  ;;  %v231_v51 = vmax.f32 %v225_v47, 0.0 }
 0x11e   :  { %v232_v53 = vmax.f32 %v227_v50, 0.0  ;;  %v233_v56 = vpack.c.bf16 %v231_v51, %v229_v54 }
 0x120   :  { %v234_v55 = vpack.c.bf16 %v232_v53, %v230_v52 }
 0x122   :  { %399 = vmatprep.mubr.bf16.mxu1 %v234_v55 }
 0x123   :  { %400 = vmatmul.mubr.bf16.vlgmr.msra.gmra.mxu1 %v233_v56 }
 0x1e3   :  { %v517_v57 = vpop.f32.mrf.mxu1 }
 0x1e5   :  { %v518_v59 = vpop.f32.mrf.mxu1 }
 0x1e6   :  { %v519_v60 = vadd.f32 %v518_v59, %v517_v57 }
 0x1e7   :  { %v520_v61 = vpop.f32.mrf.mxu1 }
 0x1e8   :  { %v402_v62 = vadd.f32 %v519_v60, %v482_v58 }
 0x1e9   :  { %v521_v63 = vpop.f32.mrf.mxu1 }
 0x1ea   :  { %v522_v0 = vadd.f32 %v521_v63, %v520_v61  ;;  %v408_v1 = vadd.f32 %v402_v62, %v72_v26 }
 0x1ec   :  { %v405_v2 = vadd.f32 %v522_v0, %v482_v58  ;;  %410 = vadd.xlane.f32.xlu0 %v408_v1 }
 0x1ee   :  { %v409_v3 = vadd.f32 %v405_v2, %v73_v27 }
 0x1f0   :  { %412 = vadd.xlane.f32.xlu0 %v409_v3 }
 0x275   :  { %v411_v4 = vpop.xlane.xlu0 %410 }
 0x276   :  { %v415_v5 = vmul.f32 0.0078125, %v411_v4 }
 0x278   :  { %v417_v6 = vsub.f32 %v408_v1, %v415_v5 }
 0x279   :  { %v413_v7 = vpop.xlane.xlu0 %412 }
 0x27a   :  { %v416_v8 = vmul.f32 0.0078125, %v413_v7  ;;  %v419_v9 = vmul.f32 %v417_v6, %v417_v6 }
 0x27c   :  { %v418_v10 = vsub.f32 %v409_v3, %v416_v8  ;;  %421 = vadd.xlane.f32.xlu1 %v419_v9 }
 0x27e   :  { %v420_v11 = vmul.f32 %v418_v10, %v418_v10 }
 0x280   :  { %423 = vadd.xlane.f32.xlu1 %v420_v11 }
 0x305   :  { %v422_v12 = vpop.xlane.xlu1 %421 }
 0x306   :  { %v425_v13 = vmul.f32 0.0078125, %v422_v12 }
 0x308   :  { %v427_v14 = vadd.f32 1e-05, %v425_v13 }
 0x309   :  { %v424_v15 = vpop.xlane.xlu1 %423 }
 0x30a   :  { %573 = vrsqrt.f32 %v427_v14  ;;  %v426_v16 = vmul.f32 0.0078125, %v424_v15 }
 0x30c   :  { %v428_v17 = vadd.f32 1e-05, %v426_v16 }
 0x30e   :  { %575 = vrsqrt.f32 %v428_v17 }
 0x317   :  { %v574_v19 = vpop.eup %573 }
 0x318   :  { %v435_v20 = vmul.f32 %v574_v19, %v499_v18 }
 0x31a   :  { %v437_v22 = vmul.f32 %v435_v20, %v417_v6 }
 0x31b   :  { %v576_v23 = vpop.eup %575 }
 0x31c   :  { %v436_v24 = vmul.f32 %v576_v23, %v499_v18  ;;  %v443_v25 = vadd.f32 %v500_v21, %v437_v22 }
 0x31e   :  { %v438_v26 = vmul.f32 %v436_v24, %v418_v10  ;;  %445 = vst [vmem:[#allocation10] sm:$0xff] %v443_v25 }
 0x320   :  { %v444_v27 = vadd.f32 %v500_v21, %v438_v26 }
 0x322   :  { %446 = vst [vmem:[#allocation10 + $0x8] sm:$0xff] %v444_v27 }
 0x323   :  { %668 = shalt.err (!%p665_p10)
}
 0x324   :  { %458 = dma.vmem_to_hbm [thread:$0]  %s453_s3, 256, %s748_s4, [#allocation4], %s687_s20, %s687_s20, %s688_s21  }
 0x325   :  { %683 = dma.done.wait [#allocation4], 256  }
 0x326   :  { %684 = vsyncadd [#allocation4], 4294967040 }
 0x327   :  { %462 = vsyncpa [#allocation3], 1 }
 0x328   :  { %463 = vsyncpa [#allocation6], 1 }
 0x329   :  { %464 = vsyncpa [#allocation9], 1 }
 0x32a   :  { %465 = vsyncpa [#allocation4], 1 }

</bundles_post_ra>
